<compile_context>
chip_gen: v5e
topology: v5e:2x2
jax: 0.10.0
libtpu: 0.0.40
codegen_flags: <defaults>
</compile_context>

<pallas_src>
import jax
import jax.numpy as jnp
from jax import lax
from jax.experimental import pallas as pl
from jax.experimental.pallas import tpu as pltpu


def attn_general_kernel(hidden_ref, enc_ref, w_ref, out_ref):
    """softmax_i( hidden . (W @ enc[i]) ) computed in reassociated form.

    hidden_ref : (1, H)   f32
    enc_ref    : (S, H)   f32   (seq-major, feature on lanes)
    w_ref      : (H, H)   f32   nn.Linear weight, native (out_features, in_features)
    out_ref    : (1, S)   f32   lane-dense attention weights
    """
    h = hidden_ref[...]                                   # (1, H)
    enc = enc_ref[...]                                    # (S, H)
    w = w_ref[...]                                        # (H, H)

    # v[j] = sum_k h[k] * W[k, j]  ==  (h^T W)          -> (1, H)
    v = jnp.dot(h, w, preferred_element_type=jnp.float32)

    # scores[0, i] = sum_j v[j] * enc[i, j]  (contract last dims, no transpose)
    scores = lax.dot_general(
        v, enc,
        dimension_numbers=(((1,), (1,)), ((), ())),
        preferred_element_type=jnp.float32,
    )                                                     # (1, S), lane-dense

    # Bias term h.b is constant across i and cancels under softmax -> omitted.
    m = jnp.max(scores, axis=-1, keepdims=True)
    e = jnp.exp(scores - m)
    inv_sum = pl.reciprocal(jnp.sum(e, axis=-1, keepdims=True), approx=True)
    out_ref[...] = e * inv_sum


def attn_forward(hidden, encoder_outputs, weight, bias=None):
    """hidden: (1, H); encoder_outputs: (S, 1, H) (PyTorch tutorial layout).

    Returns attention weights of shape (1, 1, S), matching
    F.softmax(attn_energies).unsqueeze(0).unsqueeze(0).
    `bias` is accepted for API parity but is mathematically irrelevant
    (softmax shift invariance), so it is not passed to the kernel.
    """
    S = encoder_outputs.shape[0]
    H = hidden.shape[-1]

    enc2d = encoder_outputs.reshape(S, H).astype(jnp.float32)   # glue reshape only
    # TODO(synk): if this is called once per decoder step in a loop, fuse steps
    # into one pallas_call (grid over steps) so W stays resident across steps.

    out = pl.pallas_call(
        attn_general_kernel,
        out_shape=jax.ShapeDtypeStruct((1, S), jnp.float32),
        in_specs=[
            pl.BlockSpec(memory_space=pltpu.MemorySpace.VMEM),
            pl.BlockSpec(memory_space=pltpu.MemorySpace.VMEM),
            pl.BlockSpec(memory_space=pltpu.MemorySpace.VMEM),
        ],
        out_specs=pl.BlockSpec(memory_space=pltpu.MemorySpace.VMEM),
    )(hidden.astype(jnp.float32), enc2d, weight.astype(jnp.float32))

    return out.reshape(1, 1, S)


def attn_forward_ref(hidden, encoder_outputs, weight, bias):
    """Plain-JAX reference mirroring the PyTorch loop (with bias)."""
    S = encoder_outputs.shape[0]
    H = hidden.shape[-1]
    enc2d = encoder_outputs.reshape(S, H)
    energies = []
    for i in range(S):
        e = enc2d[i] @ weight.T + bias            # nn.Linear
        energies.append(jnp.dot(hidden.reshape(-1), e.reshape(-1)))
    energies = jnp.stack(energies)
    return jax.nn.softmax(energies).reshape(1, 1, S)


if __name__ == "__main__":
    SEQ_LEN = 8
    HIDDEN = 32

    key = jax.random.PRNGKey(0)
    k_h, k_e, k_w, k_b = jax.random.split(key, 4)

    # inputs (small shapes consistent with the module's forward)
    hidden = jax.random.normal(k_h, (1, HIDDEN), dtype=jnp.float32)
    encoder_outputs = jax.random.normal(k_e, (SEQ_LEN, 1, HIDDEN), dtype=jnp.float32)

    # deterministic nn.Linear(hidden_size, hidden_size) parameters
    bound = 1.0 / (HIDDEN ** 0.5)
    attn_weight = jax.random.uniform(k_w, (HIDDEN, HIDDEN), jnp.float32, -bound, bound)
    attn_bias = jax.random.uniform(k_b, (HIDDEN,), jnp.float32, -bound, bound)

    out = attn_forward(hidden, encoder_outputs, attn_weight, attn_bias)
    out = jax.block_until_ready(out)

    ref = attn_forward_ref(hidden, encoder_outputs, attn_weight, attn_bias)
    assert out.shape == (1, 1, SEQ_LEN)
    # bias-drop is exact (shift invariance); tolerance covers approx reciprocal.
    assert jnp.allclose(out, ref, atol=1e-3, rtol=1e-3), "mismatch vs reference"

    print("KERNEL_OK")
</pallas_src>

<mosaic_0001>
module attributes {stable_mosaic.version = 11 : i64} {
  func.func @attn_general_kernel(%arg0: memref<1x32xf32, #tpu.memory_space<vmem>>, %arg1: memref<8x32xf32, #tpu.memory_space<vmem>>, %arg2: memref<32x32xf32, #tpu.memory_space<vmem>>, %arg3: memref<1x8xf32, #tpu.memory_space<vmem>>) attributes {dimension_semantics = [], scalar_prefetch = 0 : i64, scratch_operands = 0 : i64, tpu.core_type = #tpu.core_type<tc>} {
    %c0 = arith.constant 0 : index
    %c0_0 = arith.constant 0 : index
    %0 = vector.load %arg0[%c0, %c0_0] : memref<1x32xf32, #tpu.memory_space<vmem>>, vector<1x32xf32>
    %c0_1 = arith.constant 0 : index
    %c0_2 = arith.constant 0 : index
    %1 = vector.load %arg1[%c0_1, %c0_2] : memref<8x32xf32, #tpu.memory_space<vmem>>, vector<8x32xf32>
    %c0_3 = arith.constant 0 : index
    %c0_4 = arith.constant 0 : index
    %2 = vector.load %arg2[%c0_3, %c0_4] : memref<32x32xf32, #tpu.memory_space<vmem>>, vector<32x32xf32>
    %cst = arith.constant dense<0.000000e+00> : vector<1x32xf32>
    %3 = tpu.matmul %0, %2, %cst {dimension_numbers = #tpu.dot_dimension_numbers<[1], [0], [0], [1], [0, 0, 1, 1], [], []>} : vector<1x32xf32>, vector<32x32xf32>, vector<1x32xf32> -> vector<1x32xf32>
    %cst_5 = arith.constant dense<0.000000e+00> : vector<1x8xf32>
    %4 = tpu.matmul %3, %1, %cst_5 {dimension_numbers = #tpu.dot_dimension_numbers<[1], [1], [0], [0], [0, 0, 1, 0], [], []>} : vector<1x32xf32>, vector<8x32xf32>, vector<1x8xf32> -> vector<1x8xf32>
    %cst_6 = arith.constant dense<0xFF800000> : vector<1xf32>
    %5 = vector.multi_reduction <maximumf>, %4, %cst_6 [1] : vector<1x8xf32> to vector<1xf32>
    %6 = vector.shape_cast %5 : vector<1xf32> to vector<1x1xf32>
    %7 = vector.broadcast %6 : vector<1x1xf32> to vector<1x8xf32>
    %8 = arith.subf %4, %7 : vector<1x8xf32>
    %9 = math.exp %8 : vector<1x8xf32>
    %cst_7 = arith.constant dense<0.000000e+00> : vector<1xf32>
    %10 = vector.multi_reduction <add>, %9, %cst_7 [1] : vector<1x8xf32> to vector<1xf32>
    %11 = vector.shape_cast %10 : vector<1xf32> to vector<1x1xf32>
    %12 = tpu.reciprocal %11 {approx = true} : vector<1x1xf32> -> vector<1x1xf32>
    %13 = vector.broadcast %12 : vector<1x1xf32> to vector<1x8xf32>
    %14 = arith.mulf %9, %13 : vector<1x8xf32>
    %c0_8 = arith.constant 0 : index
    %c0_9 = arith.constant 0 : index
    %15 = vector.load %arg3[%c0_8, %c0_9] : memref<1x8xf32, #tpu.memory_space<vmem>>, vector<1x8xf32>
    tpu.vector_store %arg3[%c0_8, %c0_9], %14 {strides = array<i32>} : memref<1x8xf32, #tpu.memory_space<vmem>>, vector<1x8xf32>,
    return
  }
}

</mosaic_0001>

<bundles_post_ra>
// kernel: tpu_custom_call.1
= control target key start
LH: loop header
LB: loop body
LE: loop exit
PB: predicated region body
PF: predicated region fallthrough
CT: control target
= control target key end

     0   :  { %8 = vsyncpa [#allocation3], 0  ;;  %s301_s0 = inlined_call_operand.hbm [shape: f32[1,32], index: 0, kind: input, shape index: {}]   ;;  %s302_s1 = inlined_call_operand.hbm [shape: f32[8,32], index: 1, kind: input, shape index: {}]   ;;  %s303_s2 = inlined_call_operand.hbm [shape: f32[32,32], index: 2, kind: input, shape index: {}]   ;;  %s304_s3 = inlined_call_operand.hbm [shape: f32[1,8], index: 3, kind: output, shape index: {}]  }
   0x1   :  { %9 = vsyncpa [#allocation6], 0  ;;  %s27_s14 = sshll.u32 %s302_s1, 4  ;;  %s28_s14 = int_to_ptr.hbm [resolvable:$true] %s27_s14 }
   0x2   :  { %10 = vsyncpa [#allocation4], 0  ;;  %s260_s15 = smov [#allocation5]   ;;  %s16_s19 = sshll.u32 %s301_s0, 4  ;;  %s17_s19 = int_to_ptr.hbm [resolvable:$true] %s16_s19 }
   0x3   :  { %s29_s16 = sshll.u32 %s260_s15, 4  ;;  %s261_s20 = smov [#allocation2]   ;;  %s30_s16 = int_to_ptr.vmem [resolvable:$true] %s29_s16 }
   0x4   :  { %32 = dma.hbm_to_vmem [thread:$0]  %s28_s14, 128, %s30_s16, [#allocation6]  }
   0x5   :  { %s18_s21 = sshll.u32 %s261_s20, 4  ;;  %s37_s24 = sshll.u32 %s303_s2, 4  ;;  %s19_s21 = int_to_ptr.vmem [resolvable:$true] %s18_s21  ;;  %s38_s24 = int_to_ptr.hbm [resolvable:$true] %s37_s24 }
   0x6   :  { %21 = dma.hbm_to_vmem [thread:$0]  %s17_s19, 16, %s19_s21, [#allocation3]  }
   0x7   :  { %s262_s1 = smov [#allocation7]   ;;  %s263_s26 = smov 128  }
   0x8   :  { %s39_s25 = sshll.u32 %s262_s1, 4  ;;  %s264_s27 = smov 8   ;;  %s40_s25 = int_to_ptr.vmem [resolvable:$true] %s39_s25 }
   0x9   :  { %45 = dma.hbm_to_vmem [thread:$0]  %s38_s24, 512, %s40_s25, [#allocation6], %s263_s26, %s263_s26, %s264_s27  }
   0xa   :  { %254 = dma.done.wait [#allocation3], 16  }
   0xb   :  { %255 = vsyncadd [#allocation3], 4294967280 }
   0xc   :  { %256 = dma.done.wait [#allocation6], 640  }
   0xd   :  { %257 = vsyncadd [#allocation6], 4294966656  ;;  %v63_v0 = vld [vmem:[#allocation7 + $0x18] sm:$0xff]  ;;  %v62_v1 = vld [vmem:[#allocation7 + $0x10] sm:$0xff]  ;;  %vm64_vm0 = vcmask 261120   ;;  %vm114_vm1 = vcmask 57344  }
   0xe   :  { %80 = vmatpush.msra.mxu0 %v63_v0  ;;  %v59_v2 = vld [vmem:[#allocation5] sm:$0xff]  ;;  %v61_v3 = vld [vmem:[#allocation7 + $0x8] sm:$0xff]  ;;  %v60_v4 = vld [vmem:[#allocation7] sm:$0xff]  ;;  %s265_s0 = smov [#allocation8]   ;;  %s134_s30 = sshll.u32 %s304_s3, 4  ;;  %s135_s30 = int_to_ptr.hbm [resolvable:$true] %s134_s30 }
   0xf   :  { %146 = vmatpush.xpose.msk.msra.mxu1 %vm64_vm0, %v59_v2  ;;  %v58_v5 = vld [vmem:[#allocation2] sm:$0x1]  ;;  %s132_s2 = sshll.u32 %s265_s0, 4  ;;  %s133_s2 = int_to_ptr.vmem [resolvable:$true] %s132_s2 }
  0x10   :  { %81 = vmatpush.msra.mxu0 %v62_v1 }
  0x12   :  { %82 = vmatpush.msra.mxu0 %v61_v3 }
  0x14   :  { %83 = vmatpush.msra.mxu0 %v60_v4 }
  0x15   :  { %145 = vmatmul.msk.f32.vlgmr.msra.gmra.mxu0 %vm64_vm0, %v58_v5 }
  0x92   :  { %v85_v6 = vpop.f32.mrf.mxu0 }
  0x93   :  { %147 = vmatmul.msk.f32.vlgmr.msra.gmra.mxu1 %vm64_vm0, %v85_v6 }
 0x110   :  { %v111_v7 = vpop.f32.mrf.mxu1 }
 0x111   :  { %v115_v8 = vsel %vm114_vm1, %v111_v7, -inf }
 0x112   :  { %116 = vmax.xlane.f32.xlu0 %v115_v8 }
 0x185   :  { %v117_v9 = vpop.xlane.xlu0 %116 }
 0x186   :  { %v118_v10 = vsub.f32 %v111_v7, %v117_v9 }
 0x188   :  { %v119_v11 = vmul.f32 1.442695, %v118_v10 }
 0x18a   :  { %154 = vpow2.f32 %v119_v11 }
 0x190   :  { %v155_v12 = vpop.eup %154 }
 0x191   :  { %v121_v13 = vsel %vm114_vm1, %v155_v12, 0.0 }
 0x192   :  { %122 = vadd.xlane.f32.xlu0 %v121_v13 }
 0x205   :  { %v123_v14 = vpop.xlane.xlu0 %122 }
 0x206   :  { %156 = vrcp.f32 %v123_v14 }
 0x20c   :  { %v157_v15 = vpop.eup %156 }
 0x20d   :  { %v125_v16 = vmul.f32 %v157_v15, %v155_v12 }
 0x20f   :  { %126 = vst.msk [vmem:[#allocation8] sm:$0x1] %vm114_vm1, %v125_v16 }
 0x210   :  { %137 = dma.vmem_to_hbm [thread:$0]  %s133_s2, 16, %s135_s30, [#allocation4]  }
 0x211   :  { %258 = dma.done.wait [#allocation4], 16  }
 0x212   :  { %259 = vsyncadd [#allocation4], 4294967280 }
 0x213   :  { %142 = vsyncpa [#allocation3], 1 }
 0x214   :  { %143 = vsyncpa [#allocation6], 1 }
 0x215   :  { %144 = vsyncpa [#allocation4], 1 }

</bundles_post_ra>
